<compile_context>
chip_gen: v7x
topology: tpu7x:2x2x1
jax: 0.10.0
libtpu: 0.0.40
codegen_flags: <defaults>
</compile_context>

<pallas_src>
import jax
import jax.numpy as jnp
from jax.experimental import pallas as pl
from jax.experimental.pallas import tpu as pltpu


def _gru_decoder_kernel(x_ref, h0_ref, wih_ref, whh_ref, b_i_ref, b_hn_ref,
                        wout_ref, bout_ref, y_ref, hout_ref, gi_ref, hs_ref):
    """Single-invocation DecoderRNN forward (time-major flat layout).

    x_ref   : (S*B, I)  relu input, time-major flat (row = t*B + b)
    h0_ref  : (B, H)    initial hidden state
    wih_ref : (I, 3H)   packed input->hidden weights, gate order (r, z, n)
    whh_ref : (H, 3H)   packed hidden->hidden weights, gate order (r, z, n)
    b_i_ref : (1, 3H)   folded bias: [b_ir+b_hr | b_iz+b_hz | b_in]
    b_hn_ref: (1, H)    n-gate hidden bias (must stay inside r * (...))
    wout_ref: (H, O)    output Linear weight (pre-transposed)
    bout_ref: (1, O)    output Linear bias
    y_ref   : (S*B, O)  output, time-major flat
    hout_ref: (B, H)    final hidden state
    gi_ref  : (S*B, 3H) VMEM scratch: hoisted packed input pre-activations
    hs_ref  : (S*B, H)  VMEM scratch: per-timestep hidden states for the output projection
    """
    SB = x_ref.shape[0]
    B, H = h0_ref.shape
    S = SB // B

    # ---- Hoisted, non-recurrent: relu + ONE (S*B, I) x (I, 3H) MXU pass, single folded bias ----
    x = jnp.maximum(x_ref[...], 0.0)                               # F.relu(input)
    gi_ref[...] = (jnp.dot(x, wih_ref[...], preferred_element_type=jnp.float32)
                   + b_i_ref[...])

    w_hh = whh_ref[...]                                            # (H, 3H) packed
    b_hn = b_hn_ref[...]                                           # (1, H)

    # ---- Serial recurrence: fully unrolled (S static); one packed MXU call + 2 tanh per step ----
    h = h0_ref[...]                                                # (B, H)
    for t in range(S):
        gi_t = gi_ref[t * B:(t + 1) * B, :]                        # (B, 3H) one packed load
        gh = jnp.dot(h, w_hh, preferred_element_type=jnp.float32)  # (B, 3H) one MXU call
        # sigmoid(x) == 0.5 * (tanh(x/2) + 1): one EUP push covers both r and z (lanes 0:2H)
        rz = 0.5 * (jnp.tanh(0.5 * (gi_t[:, :2 * H] + gh[:, :2 * H])) + 1.0)
        r = rz[:, :H]
        z = rz[:, H:]
        n = jnp.tanh(gi_t[:, 2 * H:] + r * (gh[:, 2 * H:] + b_hn))
        h = (1.0 - z) * n + z * h
        hs_ref[t * B:(t + 1) * B, :] = h                           # time-major stash (idle vst slot)

    hout_ref[...] = h                                              # final hidden state

    # ---- Hoisted output projection: ONE (S*B, H) x (H, O) MXU call + single 2-D store ----
    y_ref[...] = (jnp.dot(hs_ref[...], wout_ref[...], preferred_element_type=jnp.float32)
                  + bout_ref[...])


def decoder_rnn_forward(x, hidden, params):
    """Pallas implementation of DecoderRNN.forward.

    x      : (B, S, I) float32  (batch-first, like the PyTorch module)
    hidden : (1, B, H) float32  (PyTorch GRU hidden layout: [num_layer=1, B, H])
    returns (output (B, S, O), hidden (1, B, H))
    """
    B, S, I = x.shape
    H = params["w_hh"].shape[0]
    O = params["w_out"].shape[1]

    b_ih, b_hh = params["b_ih"], params["b_hh"]
    # One-time parameter prep (outside the kernel, off the serial path):
    #   folded (1, 3H) bias for the hoisted input projection; separate b_hn for the n gate.
    b_i = jnp.concatenate([b_ih[:, :2 * H] + b_hh[:, :2 * H], b_ih[:, 2 * H:]], axis=1)
    b_hn = b_hh[:, 2 * H:]

    # Time-major flat input so every per-step slice in the kernel is a contiguous static window.
    x_tm = jnp.transpose(x, (1, 0, 2)).reshape(S * B, I)

    y_tm, h_final = pl.pallas_call(
        _gru_decoder_kernel,
        out_shape=(
            jax.ShapeDtypeStruct((S * B, O), jnp.float32),
            jax.ShapeDtypeStruct((B, H), jnp.float32),
        ),
        scratch_shapes=[
            pltpu.VMEM((S * B, 3 * H), jnp.float32),   # packed gi (time-major flat)
            pltpu.VMEM((S * B, H), jnp.float32),       # h_t history (time-major flat)
        ],
    )(
        x_tm, hidden[0],
        params["w_ih"], params["w_hh"],
        b_i, b_hn,
        params["w_out"], params["b_out"],
    )

    y = jnp.transpose(y_tm.reshape(S, B, O), (1, 0, 2))
    return y, h_final[None]


def _reference_forward(x, hidden, params):
    """Pure-JAX reference matching PyTorch GRU + Linear semantics."""
    H = params["w_hh"].shape[0]
    xr = jnp.maximum(x, 0.0)

    def step(h, x_t):
        gi = x_t @ params["w_ih"] + params["b_ih"][0]
        gh = h @ params["w_hh"] + params["b_hh"][0]
        r = jax.nn.sigmoid(gi[:, :H] + gh[:, :H])
        z = jax.nn.sigmoid(gi[:, H:2 * H] + gh[:, H:2 * H])
        n = jnp.tanh(gi[:, 2 * H:] + r * gh[:, 2 * H:])
        h_new = (1.0 - z) * n + z * h
        return h_new, h_new

    h_final, hs = jax.lax.scan(step, hidden[0], jnp.transpose(xr, (1, 0, 2)))
    y = hs @ params["w_out"] + params["b_out"][0]
    return jnp.transpose(y, (1, 0, 2)), h_final[None, :, :]


def init_params(key, input_size, hidden_size, output_size):
    """Deterministic synthetic init matching nn.GRU / nn.Linear parameter shapes."""
    k = jax.random.split(key, 6)
    bound = 1.0 / jnp.sqrt(hidden_size)
    u = lambda kk, shp: jax.random.uniform(kk, shp, jnp.float32, -bound, bound)
    return {
        # nn.GRU weight_ih_l0 is (3H, I) -> stored transposed (I, 3H); gate order (r, z, n).
        "w_ih": u(k[0], (input_size, 3 * hidden_size)),
        "w_hh": u(k[1], (hidden_size, 3 * hidden_size)),
        "b_ih": u(k[2], (1, 3 * hidden_size)),
        "b_hh": u(k[3], (1, 3 * hidden_size)),
        # nn.Linear weight is (O, H) -> stored transposed (H, O).
        "w_out": u(k[4], (hidden_size, output_size)),
        "b_out": u(k[5], (1, output_size)),
    }


if __name__ == "__main__":
    B, S, I, H, O = 2, 8, 16, 32, 16

    key = jax.random.PRNGKey(0)
    k_x, k_h, k_p = jax.random.split(key, 3)
    x = jax.random.normal(k_x, (B, S, I), jnp.float32)
    hidden = jax.random.normal(k_h, (1, B, H), jnp.float32)
    params = init_params(k_p, I, H, O)

    y, h_out = decoder_rnn_forward(x, hidden, params)
    y, h_out = jax.block_until_ready((y, h_out))

    y_ref, h_ref = _reference_forward(x, hidden, params)
    assert y.shape == (B, S, O) and h_out.shape == (1, B, H)
    assert jnp.allclose(y, y_ref, atol=1e-5, rtol=1e-5)
    assert jnp.allclose(h_out, h_ref, atol=1e-5, rtol=1e-5)

    print("KERNEL_OK")
</pallas_src>

<mosaic_0001>
module attributes {stable_mosaic.version = 11 : i64} {
  func.func @_gru_decoder_kernel(%arg0: memref<16x16xf32, #tpu.memory_space<vmem>>, %arg1: memref<2x32xf32, #tpu.memory_space<vmem>>, %arg2: memref<16x96xf32, #tpu.memory_space<vmem>>, %arg3: memref<32x96xf32, #tpu.memory_space<vmem>>, %arg4: memref<1x96xf32, #tpu.memory_space<vmem>>, %arg5: memref<1x32xf32, #tpu.memory_space<vmem>>, %arg6: memref<32x16xf32, #tpu.memory_space<vmem>>, %arg7: memref<1x16xf32, #tpu.memory_space<vmem>>, %arg8: memref<16x16xf32, #tpu.memory_space<vmem>>, %arg9: memref<2x32xf32, #tpu.memory_space<vmem>>, %arg10: memref<16x96xf32, #tpu.memory_space<vmem>>, %arg11: memref<16x32xf32, #tpu.memory_space<vmem>>) attributes {dimension_semantics = [], scalar_prefetch = 0 : i64, scratch_operands = 2 : i64, tpu.core_type = #tpu.core_type<tc>} {
    %c0 = arith.constant 0 : index
    %c0_0 = arith.constant 0 : index
    %0 = vector.load %arg0[%c0, %c0_0] : memref<16x16xf32, #tpu.memory_space<vmem>>, vector<16x16xf32>
    %cst = arith.constant 0.000000e+00 : f32
    %1 = vector.broadcast %cst : f32 to vector<16x16xf32>
    %2 = arith.maximumf %0, %1 : vector<16x16xf32>
    %c0_1 = arith.constant 0 : index
    %c0_2 = arith.constant 0 : index
    %3 = vector.load %arg2[%c0_1, %c0_2] : memref<16x96xf32, #tpu.memory_space<vmem>>, vector<16x96xf32>
    %cst_3 = arith.constant dense<0.000000e+00> : vector<16x96xf32>
    %4 = tpu.matmul %2, %3, %cst_3 {dimension_numbers = #tpu.dot_dimension_numbers<[1], [0], [0], [1], [0, 0, 1, 1], [], []>} : vector<16x16xf32>, vector<16x96xf32>, vector<16x96xf32> -> vector<16x96xf32>
    %c0_4 = arith.constant 0 : index
    %c0_5 = arith.constant 0 : index
    %5 = vector.load %arg4[%c0_4, %c0_5] : memref<1x96xf32, #tpu.memory_space<vmem>>, vector<1x96xf32>
    %6 = vector.broadcast %5 : vector<1x96xf32> to vector<16x96xf32>
    %7 = arith.addf %4, %6 : vector<16x96xf32>
    %c0_6 = arith.constant 0 : index
    %c0_7 = arith.constant 0 : index
    %8 = vector.load %arg10[%c0_6, %c0_7] : memref<16x96xf32, #tpu.memory_space<vmem>>, vector<16x96xf32>
    tpu.vector_store %arg10[%c0_6, %c0_7], %7 {strides = array<i32>} : memref<16x96xf32, #tpu.memory_space<vmem>>, vector<16x96xf32>,
    %c0_8 = arith.constant 0 : index
    %c0_9 = arith.constant 0 : index
    %9 = vector.load %arg3[%c0_8, %c0_9] : memref<32x96xf32, #tpu.memory_space<vmem>>, vector<32x96xf32>
    %c0_10 = arith.constant 0 : index
    %c0_11 = arith.constant 0 : index
    %10 = vector.load %arg5[%c0_10, %c0_11] : memref<1x32xf32, #tpu.memory_space<vmem>>, vector<1x32xf32>
    %c0_12 = arith.constant 0 : index
    %c0_13 = arith.constant 0 : index
    %11 = vector.load %arg1[%c0_12, %c0_13] : memref<2x32xf32, #tpu.memory_space<vmem>>, vector<2x32xf32>
    %c0_14 = arith.constant 0 : index
    %c0_15 = arith.constant 0 : index
    %12 = vector.load %arg10[%c0_14, %c0_15] : memref<16x96xf32, #tpu.memory_space<vmem>>, vector<2x96xf32>
    %cst_16 = arith.constant dense<0.000000e+00> : vector<2x96xf32>
    %13 = tpu.matmul %11, %9, %cst_16 {dimension_numbers = #tpu.dot_dimension_numbers<[1], [0], [0], [1], [0, 0, 1, 1], [], []>} : vector<2x32xf32>, vector<32x96xf32>, vector<2x96xf32> -> vector<2x96xf32>
    %14 = vector.extract_strided_slice %12 {offsets = [0, 0], sizes = [2, 64], strides = [1, 1]} : vector<2x96xf32> to vector<2x64xf32>
    %15 = vector.extract_strided_slice %13 {offsets = [0, 0], sizes = [2, 64], strides = [1, 1]} : vector<2x96xf32> to vector<2x64xf32>
    %16 = arith.addf %14, %15 : vector<2x64xf32>
    %cst_17 = arith.constant 5.000000e-01 : f32
    %17 = vector.broadcast %cst_17 : f32 to vector<2x64xf32>
    %18 = arith.mulf %17, %16 : vector<2x64xf32>
    %19 = math.tanh %18 : vector<2x64xf32>
    %cst_18 = arith.constant 1.000000e+00 : f32
    %20 = vector.broadcast %cst_18 : f32 to vector<2x64xf32>
    %21 = arith.addf %19, %20 : vector<2x64xf32>
    %cst_19 = arith.constant 5.000000e-01 : f32
    %22 = vector.broadcast %cst_19 : f32 to vector<2x64xf32>
    %23 = arith.mulf %22, %21 : vector<2x64xf32>
    %24 = vector.extract_strided_slice %23 {offsets = [0, 0], sizes = [2, 32], strides = [1, 1]} : vector<2x64xf32> to vector<2x32xf32>
    %25 = vector.extract_strided_slice %23 {offsets = [0, 32], sizes = [2, 32], strides = [1, 1]} : vector<2x64xf32> to vector<2x32xf32>
    %26 = vector.extract_strided_slice %12 {offsets = [0, 64], sizes = [2, 32], strides = [1, 1]} : vector<2x96xf32> to vector<2x32xf32>
    %27 = vector.extract_strided_slice %13 {offsets = [0, 64], sizes = [2, 32], strides = [1, 1]} : vector<2x96xf32> to vector<2x32xf32>
    %28 = vector.broadcast %10 : vector<1x32xf32> to vector<2x32xf32>
    %29 = arith.addf %27, %28 : vector<2x32xf32>
    %30 = arith.mulf %24, %29 : vector<2x32xf32>
    %31 = arith.addf %26, %30 : vector<2x32xf32>
    %32 = math.tanh %31 : vector<2x32xf32>
    %cst_20 = arith.constant 1.000000e+00 : f32
    %33 = vector.broadcast %cst_20 : f32 to vector<2x32xf32>
    %34 = arith.subf %33, %25 : vector<2x32xf32>
    %35 = arith.mulf %34, %32 : vector<2x32xf32>
    %36 = arith.mulf %25, %11 : vector<2x32xf32>
    %37 = arith.addf %35, %36 : vector<2x32xf32>
    %c0_21 = arith.constant 0 : index
    %c0_22 = arith.constant 0 : index
    %38 = vector.load %arg11[%c0_21, %c0_22] : memref<16x32xf32, #tpu.memory_space<vmem>>, vector<2x32xf32>
    tpu.vector_store %arg11[%c0_21, %c0_22], %37 {strides = array<i32>} : memref<16x32xf32, #tpu.memory_space<vmem>>, vector<2x32xf32>,
    %c2 = arith.constant 2 : index
    %c0_23 = arith.constant 0 : index
    %39 = vector.load %arg10[%c2, %c0_23] : memref<16x96xf32, #tpu.memory_space<vmem>>, vector<2x96xf32>
    %cst_24 = arith.constant dense<0.000000e+00> : vector<2x96xf32>
    %40 = tpu.matmul %37, %9, %cst_24 {dimension_numbers = #tpu.dot_dimension_numbers<[1], [0], [0], [1], [0, 0, 1, 1], [], []>} : vector<2x32xf32>, vector<32x96xf32>, vector<2x96xf32> -> vector<2x96xf32>
    %41 = vector.extract_strided_slice %39 {offsets = [0, 0], sizes = [2, 64], strides = [1, 1]} : vector<2x96xf32> to vector<2x64xf32>
    %42 = vector.extract_strided_slice %40 {offsets = [0, 0], sizes = [2, 64], strides = [1, 1]} : vector<2x96xf32> to vector<2x64xf32>
    %43 = arith.addf %41, %42 : vector<2x64xf32>
    %cst_25 = arith.constant 5.000000e-01 : f32
    %44 = vector.broadcast %cst_25 : f32 to vector<2x64xf32>
    %45 = arith.mulf %44, %43 : vector<2x64xf32>
    %46 = math.tanh %45 : vector<2x64xf32>
    %cst_26 = arith.constant 1.000000e+00 : f32
    %47 = vector.broadcast %cst_26 : f32 to vector<2x64xf32>
    %48 = arith.addf %46, %47 : vector<2x64xf32>
    %cst_27 = arith.constant 5.000000e-01 : f32
    %49 = vector.broadcast %cst_27 : f32 to vector<2x64xf32>
    %50 = arith.mulf %49, %48 : vector<2x64xf32>
    %51 = vector.extract_strided_slice %50 {offsets = [0, 0], sizes = [2, 32], strides = [1, 1]} : vector<2x64xf32> to vector<2x32xf32>
    %52 = vector.extract_strided_slice %50 {offsets = [0, 32], sizes = [2, 32], strides = [1, 1]} : vector<2x64xf32> to vector<2x32xf32>
    %53 = vector.extract_strided_slice %39 {offsets = [0, 64], sizes = [2, 32], strides = [1, 1]} : vector<2x96xf32> to vector<2x32xf32>
    %54 = vector.extract_strided_slice %40 {offsets = [0, 64], sizes = [2, 32], strides = [1, 1]} : vector<2x96xf32> to vector<2x32xf32>
    %55 = vector.broadcast %10 : vector<1x32xf32> to vector<2x32xf32>
    %56 = arith.addf %54, %55 : vector<2x32xf32>
    %57 = arith.mulf %51, %56 : vector<2x32xf32>
    %58 = arith.addf %53, %57 : vector<2x32xf32>
    %59 = math.tanh %58 : vector<2x32xf32>
    %cst_28 = arith.constant 1.000000e+00 : f32
    %60 = vector.broadcast %cst_28 : f32 to vector<2x32xf32>
    %61 = arith.subf %60, %52 : vector<2x32xf32>
    %62 = arith.mulf %61, %59 : vector<2x32xf32>
    %63 = arith.mulf %52, %37 : vector<2x32xf32>
    %64 = arith.addf %62, %63 : vector<2x32xf32>
    %c2_29 = arith.constant 2 : index
    %c0_30 = arith.constant 0 : index
    %65 = vector.load %arg11[%c2_29, %c0_30] : memref<16x32xf32, #tpu.memory_space<vmem>>, vector<2x32xf32>
    tpu.vector_store %arg11[%c2_29, %c0_30], %64 {strides = array<i32>} : memref<16x32xf32, #tpu.memory_space<vmem>>, vector<2x32xf32>,
    %c4 = arith.constant 4 : index
    %c0_31 = arith.constant 0 : index
    %66 = vector.load %arg10[%c4, %c0_31] : memref<16x96xf32, #tpu.memory_space<vmem>>, vector<2x96xf32>
    %cst_32 = arith.constant dense<0.000000e+00> : vector<2x96xf32>
    %67 = tpu.matmul %64, %9, %cst_32 {dimension_numbers = #tpu.dot_dimension_numbers<[1], [0], [0], [1], [0, 0, 1, 1], [], []>} : vector<2x32xf32>, vector<32x96xf32>, vector<2x96xf32> -> vector<2x96xf32>
    %68 = vector.extract_strided_slice %66 {offsets = [0, 0], sizes = [2, 64], strides = [1, 1]} : vector<2x96xf32> to vector<2x64xf32>
    %69 = vector.extract_strided_slice %67 {offsets = [0, 0], sizes = [2, 64], strides = [1, 1]} : vector<2x96xf32> to vector<2x64xf32>
    %70 = arith.addf %68, %69 : vector<2x64xf32>
    %cst_33 = arith.constant 5.000000e-01 : f32
    %71 = vector.broadcast %cst_33 : f32 to vector<2x64xf32>
    %72 = arith.mulf %71, %70 : vector<2x64xf32>
    %73 = math.tanh %72 : vector<2x64xf32>
    %cst_34 = arith.constant 1.000000e+00 : f32
    %74 = vector.broadcast %cst_34 : f32 to vector<2x64xf32>
    %75 = arith.addf %73, %74 : vector<2x64xf32>
    %cst_35 = arith.constant 5.000000e-01 : f32
    %76 = vector.broadcast %cst_35 : f32 to vector<2x64xf32>
    %77 = arith.mulf %76, %75 : vector<2x64xf32>
    %78 = vector.extract_strided_slice %77 {offsets = [0, 0], sizes = [2, 32], strides = [1, 1]} : vector<2x64xf32> to vector<2x32xf32>
    %79 = vector.extract_strided_slice %77 {offsets = [0, 32], sizes = [2, 32], strides = [1, 1]} : vector<2x64xf32> to vector<2x32xf32>
    %80 = vector.extract_strided_slice %66 {offsets = [0, 64], sizes = [2, 32], strides = [1, 1]} : vector<2x96xf32> to vector<2x32xf32>
    %81 = vector.extract_strided_slice %67 {offsets = [0, 64], sizes = [2, 32], strides = [1, 1]} : vector<2x96xf32> to vector<2x32xf32>
    %82 = vector.broadcast %10 : vector<1x32xf32> to vector<2x32xf32>
    %83 = arith.addf %81, %82 : vector<2x32xf32>
    %84 = arith.mulf %78, %83 : vector<2x32xf32>
    %85 = arith.addf %80, %84 : vector<2x32xf32>
    %86 = math.tanh %85 : vector<2x32xf32>
    %cst_36 = arith.constant 1.000000e+00 : f32
    %87 = vector.broadcast %cst_36 : f32 to vector<2x32xf32>
    %88 = arith.subf %87, %79 : vector<2x32xf32>
    %89 = arith.mulf %88, %86 : vector<2x32xf32>
    %90 = arith.mulf %79, %64 : vector<2x32xf32>
    %91 = arith.addf %89, %90 : vector<2x32xf32>
    %c4_37 = arith.constant 4 : index
    %c0_38 = arith.constant 0 : index
    %92 = vector.load %arg11[%c4_37, %c0_38] : memref<16x32xf32, #tpu.memory_space<vmem>>, vector<2x32xf32>
    tpu.vector_store %arg11[%c4_37, %c0_38], %91 {strides = array<i32>} : memref<16x32xf32, #tpu.memory_space<vmem>>, vector<2x32xf32>,
    %c6 = arith.constant 6 : index
    %c0_39 = arith.constant 0 : index
    %93 = vector.load %arg10[%c6, %c0_39] : memref<16x96xf32, #tpu.memory_space<vmem>>, vector<2x96xf32>
    %cst_40 = arith.constant dense<0.000000e+00> : vector<2x96xf32>
    %94 = tpu.matmul %91, %9, %cst_40 {dimension_numbers = #tpu.dot_dimension_numbers<[1], [0], [0], [1], [0, 0, 1, 1], [], []>} : vector<2x32xf32>, vector<32x96xf32>, vector<2x96xf32> -> vector<2x96xf32>
    %95 = vector.extract_strided_slice %93 {offsets = [0, 0], sizes = [2, 64], strides = [1, 1]} : vector<2x96xf32> to vector<2x64xf32>
    %96 = vector.extract_strided_slice %94 {offsets = [0, 0], sizes = [2, 64], strides = [1, 1]} : vector<2x96xf32> to vector<2x64xf32>
    %97 = arith.addf %95, %96 : vector<2x64xf32>
    %cst_41 = arith.constant 5.000000e-01 : f32
    %98 = vector.broadcast %cst_41 : f32 to vector<2x64xf32>
    %99 = arith.mulf %98, %97 : vector<2x64xf32>
    %100 = math.tanh %99 : vector<2x64xf32>
    %cst_42 = arith.constant 1.000000e+00 : f32
    %101 = vector.broadcast %cst_42 : f32 to vector<2x64xf32>
    %102 = arith.addf %100, %101 : vector<2x64xf32>
    %cst_43 = arith.constant 5.000000e-01 : f32
    %103 = vector.broadcast %cst_43 : f32 to vector<2x64xf32>
    %104 = arith.mulf %103, %102 : vector<2x64xf32>
    %105 = vector.extract_strided_slice %104 {offsets = [0, 0], sizes = [2, 32], strides = [1, 1]} : vector<2x64xf32> to vector<2x32xf32>
    %106 = vector.extract_strided_slice %104 {offsets = [0, 32], sizes = [2, 32], strides = [1, 1]} : vector<2x64xf32> to vector<2x32xf32>
    %107 = vector.extract_strided_slice %93 {offsets = [0, 64], sizes = [2, 32], strides = [1, 1]} : vector<2x96xf32> to vector<2x32xf32>
    %108 = vector.extract_strided_slice %94 {offsets = [0, 64], sizes = [2, 32], strides = [1, 1]} : vector<2x96xf32> to vector<2x32xf32>
    %109 = vector.broadcast %10 : vector<1x32xf32> to vector<2x32xf32>
    %110 = arith.addf %108, %109 : vector<2x32xf32>
    %111 = arith.mulf %105, %110 : vector<2x32xf32>
    %112 = arith.addf %107, %111 : vector<2x32xf32>
    %113 = math.tanh %112 : vector<2x32xf32>
    %cst_44 = arith.constant 1.000000e+00 : f32
    %114 = vector.broadcast %cst_44 : f32 to vector<2x32xf32>
    %115 = arith.subf %114, %106 : vector<2x32xf32>
    %116 = arith.mulf %115, %113 : vector<2x32xf32>
    %117 = arith.mulf %106, %91 : vector<2x32xf32>
    %118 = arith.addf %116, %117 : vector<2x32xf32>
    %c6_45 = arith.constant 6 : index
    %c0_46 = arith.constant 0 : index
    %119 = vector.load %arg11[%c6_45, %c0_46] : memref<16x32xf32, #tpu.memory_space<vmem>>, vector<2x32xf32>
    tpu.vector_store %arg11[%c6_45, %c0_46], %118 {strides = array<i32>} : memref<16x32xf32, #tpu.memory_space<vmem>>, vector<2x32xf32>,
    %c8 = arith.constant 8 : index
    %c0_47 = arith.constant 0 : index
    %120 = vector.load %arg10[%c8, %c0_47] : memref<16x96xf32, #tpu.memory_space<vmem>>, vector<2x96xf32>
    %cst_48 = arith.constant dense<0.000000e+00> : vector<2x96xf32>
    %121 = tpu.matmul %118, %9, %cst_48 {dimension_numbers = #tpu.dot_dimension_numbers<[1], [0], [0], [1], [0, 0, 1, 1], [], []>} : vector<2x32xf32>, vector<32x96xf32>, vector<2x96xf32> -> vector<2x96xf32>
    %122 = vector.extract_strided_slice %120 {offsets = [0, 0], sizes = [2, 64], strides = [1, 1]} : vector<2x96xf32> to vector<2x64xf32>
    %123 = vector.extract_strided_slice %121 {offsets = [0, 0], sizes = [2, 64], strides = [1, 1]} : vector<2x96xf32> to vector<2x64xf32>
    %124 = arith.addf %122, %123 : vector<2x64xf32>
    %cst_49 = arith.constant 5.000000e-01 : f32
    %125 = vector.broadcast %cst_49 : f32 to vector<2x64xf32>
    %126 = arith.mulf %125, %124 : vector<2x64xf32>
    %127 = math.tanh %126 : vector<2x64xf32>
    %cst_50 = arith.constant 1.000000e+00 : f32
    %128 = vector.broadcast %cst_50 : f32 to vector<2x64xf32>
    %129 = arith.addf %127, %128 : vector<2x64xf32>
    %cst_51 = arith.constant 5.000000e-01 : f32
    %130 = vector.broadcast %cst_51 : f32 to vector<2x64xf32>
    %131 = arith.mulf %130, %129 : vector<2x64xf32>
    %132 = vector.extract_strided_slice %131 {offsets = [0, 0], sizes = [2, 32], strides = [1, 1]} : vector<2x64xf32> to vector<2x32xf32>
    %133 = vector.extract_strided_slice %131 {offsets = [0, 32], sizes = [2, 32], strides = [1, 1]} : vector<2x64xf32> to vector<2x32xf32>
    %134 = vector.extract_strided_slice %120 {offsets = [0, 64], sizes = [2, 32], strides = [1, 1]} : vector<2x96xf32> to vector<2x32xf32>
    %135 = vector.extract_strided_slice %121 {offsets = [0, 64], sizes = [2, 32], strides = [1, 1]} : vector<2x96xf32> to vector<2x32xf32>
    %136 = vector.broadcast %10 : vector<1x32xf32> to vector<2x32xf32>
    %137 = arith.addf %135, %136 : vector<2x32xf32>
    %138 = arith.mulf %132, %137 : vector<2x32xf32>
    %139 = arith.addf %134, %138 : vector<2x32xf32>
    %140 = math.tanh %139 : vector<2x32xf32>
    %cst_52 = arith.constant 1.000000e+00 : f32
    %141 = vector.broadcast %cst_52 : f32 to vector<2x32xf32>
    %142 = arith.subf %141, %133 : vector<2x32xf32>
    %143 = arith.mulf %142, %140 : vector<2x32xf32>
    %144 = arith.mulf %133, %118 : vector<2x32xf32>
    %145 = arith.addf %143, %144 : vector<2x32xf32>
    %c8_53 = arith.constant 8 : index
    %c0_54 = arith.constant 0 : index
    %146 = vector.load %arg11[%c8_53, %c0_54] : memref<16x32xf32, #tpu.memory_space<vmem>>, vector<2x32xf32>
    tpu.vector_store %arg11[%c8_53, %c0_54], %145 {strides = array<i32>} : memref<16x32xf32, #tpu.memory_space<vmem>>, vector<2x32xf32>,
    %c10 = arith.constant 10 : index
    %c0_55 = arith.constant 0 : index
    %147 = vector.load %arg10[%c10, %c0_55] : memref<16x96xf32, #tpu.memory_space<vmem>>, vector<2x96xf32>
    %cst_56 = arith.constant dense<0.000000e+00> : vector<2x96xf32>
    %148 = tpu.matmul %145, %9, %cst_56 {dimension_numbers = #tpu.dot_dimension_numbers<[1], [0], [0], [1], [0, 0, 1, 1], [], []>} : vector<2x32xf32>, vector<32x96xf32>, vector<2x96xf32> -> vector<2x96xf32>
    %149 = vector.extract_strided_slice %147 {offsets = [0, 0], sizes = [2, 64], strides = [1, 1]} : vector<2x96xf32> to vector<2x64xf32>
    %150 = vector.extract_strided_slice %148 {offsets = [0, 0], sizes = [2, 64], strides = [1, 1]} : vector<2x96xf32> to vector<2x64xf32>
    %151 = arith.addf %149, %150 : vector<2x64xf32>
    %cst_57 = arith.constant 5.000000e-01 : f32
    %152 = vector.broadcast %cst_57 : f32 to vector<2x64xf32>
    %153 = arith.mulf %152, %151 : vector<2x64xf32>
    %154 = math.tanh %153 : vector<2x64xf32>
    %cst_58 = arith.constant 1.000000e+00 : f32
    %155 = vector.broadcast %cst_58 : f32 to vector<2x64xf32>
    %156 = arith.addf %154, %155 : vector<2x64xf32>
    %cst_59 = arith.constant 5.000000e-01 : f32
    %157 = vector.broadcast %cst_59 : f32 to vector<2x64xf32>
    %158 = arith.mulf %157, %156 : vector<2x64xf32>
    %159 = vector.extract_strided_slice %158 {offsets = [0, 0], sizes = [2, 32], strides = [1, 1]} : vector<2x64xf32> to vector<2x32xf32>
    %160 = vector.extract_strided_slice %158 {offsets = [0, 32], sizes = [2, 32], strides = [1, 1]} : vector<2x64xf32> to vector<2x32xf32>
    %161 = vector.extract_strided_slice %147 {offsets = [0, 64], sizes = [2, 32], strides = [1, 1]} : vector<2x96xf32> to vector<2x32xf32>
    %162 = vector.extract_strided_slice %148 {offsets = [0, 64], sizes = [2, 32], strides = [1, 1]} : vector<2x96xf32> to vector<2x32xf32>
    %163 = vector.broadcast %10 : vector<1x32xf32> to vector<2x32xf32>
    %164 = arith.addf %162, %163 : vector<2x32xf32>
    %165 = arith.mulf %159, %164 : vector<2x32xf32>
    %166 = arith.addf %161, %165 : vector<2x32xf32>
    %167 = math.tanh %166 : vector<2x32xf32>
    %cst_60 = arith.constant 1.000000e+00 : f32
    %168 = vector.broadcast %cst_60 : f32 to vector<2x32xf32>
    %169 = arith.subf %168, %160 : vector<2x32xf32>
    %170 = arith.mulf %169, %167 : vector<2x32xf32>
    %171 = arith.mulf %160, %145 : vector<2x32xf32>
    %172 = arith.addf %170, %171 : vector<2x32xf32>
    %c10_61 = arith.constant 10 : index
    %c0_62 = arith.constant 0 : index
    %173 = vector.load %arg11[%c10_61, %c0_62] : memref<16x32xf32, #tpu.memory_space<vmem>>, vector<2x32xf32>
    tpu.vector_store %arg11[%c10_61, %c0_62], %172 {strides = array<i32>} : memref<16x32xf32, #tpu.memory_space<vmem>>, vector<2x32xf32>,
    %c12 = arith.constant 12 : index
    %c0_63 = arith.constant 0 : index
    %174 = vector.load %arg10[%c12, %c0_63] : memref<16x96xf32, #tpu.memory_space<vmem>>, vector<2x96xf32>
    %cst_64 = arith.constant dense<0.000000e+00> : vector<2x96xf32>
    %175 = tpu.matmul %172, %9, %cst_64 {dimension_numbers = #tpu.dot_dimension_numbers<[1], [0], [0], [1], [0, 0, 1, 1], [], []>} : vector<2x32xf32>, vector<32x96xf32>, vector<2x96xf32> -> vector<2x96xf32>
    %176 = vector.extract_strided_slice %174 {offsets = [0, 0], sizes = [2, 64], strides = [1, 1]} : vector<2x96xf32> to vector<2x64xf32>
    %177 = vector.extract_strided_slice %175 {offsets = [0, 0], sizes = [2, 64], strides = [1, 1]} : vector<2x96xf32> to vector<2x64xf32>
    %178 = arith.addf %176, %177 : vector<2x64xf32>
    %cst_65 = arith.constant 5.000000e-01 : f32
    %179 = vector.broadcast %cst_65 : f32 to vector<2x64xf32>
    %180 = arith.mulf %179, %178 : vector<2x64xf32>
    %181 = math.tanh %180 : vector<2x64xf32>
    %cst_66 = arith.constant 1.000000e+00 : f32
    %182 = vector.broadcast %cst_66 : f32 to vector<2x64xf32>
    %183 = arith.addf %181, %182 : vector<2x64xf32>
    %cst_67 = arith.constant 5.000000e-01 : f32
    %184 = vector.broadcast %cst_67 : f32 to vector<2x64xf32>
    %185 = arith.mulf %184, %183 : vector<2x64xf32>
    %186 = vector.extract_strided_slice %185 {offsets = [0, 0], sizes = [2, 32], strides = [1, 1]} : vector<2x64xf32> to vector<2x32xf32>
    %187 = vector.extract_strided_slice %185 {offsets = [0, 32], sizes = [2, 32], strides = [1, 1]} : vector<2x64xf32> to vector<2x32xf32>
    %188 = vector.extract_strided_slice %174 {offsets = [0, 64], sizes = [2, 32], strides = [1, 1]} : vector<2x96xf32> to vector<2x32xf32>
    %189 = vector.extract_strided_slice %175 {offsets = [0, 64], sizes = [2, 32], strides = [1, 1]} : vector<2x96xf32> to vector<2x32xf32>
    %190 = vector.broadcast %10 : vector<1x32xf32> to vector<2x32xf32>
    %191 = arith.addf %189, %190 : vector<2x32xf32>
    %192 = arith.mulf %186, %191 : vector<2x32xf32>
    %193 = arith.addf %188, %192 : vector<2x32xf32>
    %194 = math.tanh %193 : vector<2x32xf32>
    %cst_68 = arith.constant 1.000000e+00 : f32
    %195 = vector.broadcast %cst_68 : f32 to vector<2x32xf32>
    %196 = arith.subf %195, %187 : vector<2x32xf32>
    %197 = arith.mulf %196, %194 : vector<2x32xf32>
    %198 = arith.mulf %187, %172 : vector<2x32xf32>
    %199 = arith.addf %197, %198 : vector<2x32xf32>
    %c12_69 = arith.constant 12 : index
    %c0_70 = arith.constant 0 : index
    %200 = vector.load %arg11[%c12_69, %c0_70] : memref<16x32xf32, #tpu.memory_space<vmem>>, vector<2x32xf32>
    tpu.vector_store %arg11[%c12_69, %c0_70], %199 {strides = array<i32>} : memref<16x32xf32, #tpu.memory_space<vmem>>, vector<2x32xf32>,
    %c14 = arith.constant 14 : index
    %c0_71 = arith.constant 0 : index
    %201 = vector.load %arg10[%c14, %c0_71] : memref<16x96xf32, #tpu.memory_space<vmem>>, vector<2x96xf32>
    %cst_72 = arith.constant dense<0.000000e+00> : vector<2x96xf32>
    %202 = tpu.matmul %199, %9, %cst_72 {dimension_numbers = #tpu.dot_dimension_numbers<[1], [0], [0], [1], [0, 0, 1, 1], [], []>} : vector<2x32xf32>, vector<32x96xf32>, vector<2x96xf32> -> vector<2x96xf32>
    %203 = vector.extract_strided_slice %201 {offsets = [0, 0], sizes = [2, 64], strides = [1, 1]} : vector<2x96xf32> to vector<2x64xf32>
    %204 = vector.extract_strided_slice %202 {offsets = [0, 0], sizes = [2, 64], strides = [1, 1]} : vector<2x96xf32> to vector<2x64xf32>
    %205 = arith.addf %203, %204 : vector<2x64xf32>
    %cst_73 = arith.constant 5.000000e-01 : f32
    %206 = vector.broadcast %cst_73 : f32 to vector<2x64xf32>
    %207 = arith.mulf %206, %205 : vector<2x64xf32>
    %208 = math.tanh %207 : vector<2x64xf32>
    %cst_74 = arith.constant 1.000000e+00 : f32
    %209 = vector.broadcast %cst_74 : f32 to vector<2x64xf32>
    %210 = arith.addf %208, %209 : vector<2x64xf32>
    %cst_75 = arith.constant 5.000000e-01 : f32
    %211 = vector.broadcast %cst_75 : f32 to vector<2x64xf32>
    %212 = arith.mulf %211, %210 : vector<2x64xf32>
    %213 = vector.extract_strided_slice %212 {offsets = [0, 0], sizes = [2, 32], strides = [1, 1]} : vector<2x64xf32> to vector<2x32xf32>
    %214 = vector.extract_strided_slice %212 {offsets = [0, 32], sizes = [2, 32], strides = [1, 1]} : vector<2x64xf32> to vector<2x32xf32>
    %215 = vector.extract_strided_slice %201 {offsets = [0, 64], sizes = [2, 32], strides = [1, 1]} : vector<2x96xf32> to vector<2x32xf32>
    %216 = vector.extract_strided_slice %202 {offsets = [0, 64], sizes = [2, 32], strides = [1, 1]} : vector<2x96xf32> to vector<2x32xf32>
    %217 = vector.broadcast %10 : vector<1x32xf32> to vector<2x32xf32>
    %218 = arith.addf %216, %217 : vector<2x32xf32>
    %219 = arith.mulf %213, %218 : vector<2x32xf32>
    %220 = arith.addf %215, %219 : vector<2x32xf32>
    %221 = math.tanh %220 : vector<2x32xf32>
    %cst_76 = arith.constant 1.000000e+00 : f32
    %222 = vector.broadcast %cst_76 : f32 to vector<2x32xf32>
    %223 = arith.subf %222, %214 : vector<2x32xf32>
    %224 = arith.mulf %223, %221 : vector<2x32xf32>
    %225 = arith.mulf %214, %199 : vector<2x32xf32>
    %226 = arith.addf %224, %225 : vector<2x32xf32>
    %c14_77 = arith.constant 14 : index
    %c0_78 = arith.constant 0 : index
    %227 = vector.load %arg11[%c14_77, %c0_78] : memref<16x32xf32, #tpu.memory_space<vmem>>, vector<2x32xf32>
    tpu.vector_store %arg11[%c14_77, %c0_78], %226 {strides = array<i32>} : memref<16x32xf32, #tpu.memory_space<vmem>>, vector<2x32xf32>,
    %c0_79 = arith.constant 0 : index
    %c0_80 = arith.constant 0 : index
    %228 = vector.load %arg9[%c0_79, %c0_80] : memref<2x32xf32, #tpu.memory_space<vmem>>, vector<2x32xf32>
    tpu.vector_store %arg9[%c0_79, %c0_80], %226 {strides = array<i32>} : memref<2x32xf32, #tpu.memory_space<vmem>>, vector<2x32xf32>,
    %c0_81 = arith.constant 0 : index
    %c0_82 = arith.constant 0 : index
    %229 = vector.load %arg11[%c0_81, %c0_82] : memref<16x32xf32, #tpu.memory_space<vmem>>, vector<16x32xf32>
    %c0_83 = arith.constant 0 : index
    %c0_84 = arith.constant 0 : index
    %230 = vector.load %arg6[%c0_83, %c0_84] : memref<32x16xf32, #tpu.memory_space<vmem>>, vector<32x16xf32>
    %cst_85 = arith.constant dense<0.000000e+00> : vector<16x16xf32>
    %231 = tpu.matmul %229, %230, %cst_85 {dimension_numbers = #tpu.dot_dimension_numbers<[1], [0], [0], [1], [0, 0, 1, 1], [], []>} : vector<16x32xf32>, vector<32x16xf32>, vector<16x16xf32> -> vector<16x16xf32>
    %c0_86 = arith.constant 0 : index
    %c0_87 = arith.constant 0 : index
    %232 = vector.load %arg7[%c0_86, %c0_87] : memref<1x16xf32, #tpu.memory_space<vmem>>, vector<1x16xf32>
    %233 = vector.broadcast %232 : vector<1x16xf32> to vector<16x16xf32>
    %234 = arith.addf %231, %233 : vector<16x16xf32>
    %c0_88 = arith.constant 0 : index
    %c0_89 = arith.constant 0 : index
    %235 = vector.load %arg8[%c0_88, %c0_89] : memref<16x16xf32, #tpu.memory_space<vmem>>, vector<16x16xf32>
    tpu.vector_store %arg8[%c0_88, %c0_89], %234 {strides = array<i32>} : memref<16x16xf32, #tpu.memory_space<vmem>>, vector<16x16xf32>,
    return
  }
}

</mosaic_0001>

<bundles_post_ra>
// kernel: tpu_custom_call.1
= control target key start
LH: loop header
LB: loop body
LE: loop exit
PB: predicated region body
PF: predicated region fallthrough
CT: control target
= control target key end

     0   :  { %15 = vsyncpa [#allocation5], 0  ;;  %s1726_s0 = inlined_call_operand.vmem [shape: f32[16,16], index: 0, kind: input, shape index: {}]   ;;  %s1727_s1 = inlined_call_operand.vmem [shape: f32[2,32], index: 1, kind: input, shape index: {}]   ;;  %s1728_s2 = inlined_call_operand.hbm [shape: f32[16,96], index: 2, kind: input, shape index: {}]   ;;  %s1729_s3 = inlined_call_operand.vmem [shape: f32[32,96], index: 3, kind: input, shape index: {}]   ;;  %s1730_s4 = inlined_call_operand.vmem [shape: f32[1,96], index: 4, kind: input, shape index: {}]   ;;  %s1731_s5 = inlined_call_operand.vmem [shape: f32[1,32], index: 5, kind: input, shape index: {}]   ;;  %s1732_s6 = inlined_call_operand.vmem [shape: f32[32,16], index: 6, kind: input, shape index: {}]   ;;  %s1733_s7 = inlined_call_operand.vmem [shape: f32[1,16], index: 7, kind: input, shape index: {}]   ;;  %s1734_s8 = inlined_call_operand.hbm [shape: f32[16,16], index: 8, kind: output, shape index: {0}]   ;;  %s1735_s9 = inlined_call_operand.hbm [shape: f32[2,32], index: 9, kind: output, shape index: {1}]  }
   0x1   :  { %16 = vsyncpa [#allocation6], 0 }
   0x2   :  { %17 = vsyncpa [#allocation9], 0  ;;  %s1463_s30 = smov [#allocation4]   ;;  %s1391_s13 = scalar_lea.hbm %s1728_s2, 256 }
   0x3   :  { %s27_s10 = sshll.u32 %s1463_s30, 4  ;;  %p1392_p0 = scmp.ne.s32.totalorder %s1728_s2, %s1391_s13  ;;  %s28_s10 = int_to_ptr.vmem [resolvable:$true] %s27_s10 }
   0x4   :  { %p1395_p1 = scmp.lt.u32.totalorder %s1391_s13, %s1728_s2 }
   0x6   :  { %p1397_p2 = pnand %p1395_p1, %p1392_p0 }
   0x8   :  { %1400 = shalt.err (!%p1397_p2)
}
   0x9   :  { %s1401_s18 = scalar_lea.vmem %s28_s10, 256  ;;  %p1406_p4 = scmp.lt.s32.totalorder %s28_s10, %s28_s10 }
   0xa   :  { %p1402_p3 = scmp.ne.s32.totalorder %s28_s10, %s1401_s18  ;;  %p1407_p5 = scmp.lt.s32.totalorder %s1401_s18, %s1401_s18 }
   0xc   :  { %p1408_p6 = por %p1407_p5, %p1406_p4 }
   0xe   :  { %p1409_p7 = pnand %p1408_p6, %p1402_p3 }
  0x10   :  { %1412 = shalt.err (!%p1409_p7)
}
  0x11   :  { %s1464_s19 = smov 128   ;;  %s1465_s20 = smov 8  }
  0x12   :  { %33 = dma.hbm_to_vmem [thread:$0]  %s1728_s2, 256, %s28_s10, [#allocation5], %s1464_s19, %s1464_s19, %s1465_s20  }
  0x13   :  { %1457 = dma.done.wait [#allocation5], 256  }
  0x14   :  { %1458 = vsyncadd [#allocation5], 4294967040  ;;  %v1466_v0 = vmov 0.0|0.0   ;;  %vm1467_vm0 = vmmov 0   ;;  %v1468_v1 = vmov 0.0   ;;  %v51_v2 = vld [vmem:[#allocation4] sm:$0xff] }
  0x15   :  { %1292 = vmatprep.subr.bf16.mxu1 %v1466_v0  ;;  %1197 = vmatprep.mubr.msk.f32.mxu1 %vm1467_vm0, %v1468_v1  ;;  %v52_v3 = vld [vmem:[#allocation4 + $0x8] sm:$0xff]  ;;  %v145_v4 = vld [vmem:[%s1729_s3] sm:$0xff]  ;;  %vm60_vm1 = vcmask 130048   ;;  %v147_v11 = vld [vmem:[%s1729_s3 + $0x10] sm:$0xff]  ;;  %vm152_vm2 = vcmask 261120   ;;  %vm142_vm3 = vcmask 785408  }
  0x16   :  { %v1288_v5 = vpack.c.bf16 %v52_v3, %v51_v2  ;;  %v146_v6 = vld [vmem:[%s1729_s3 + $0x8] sm:$0xff]  ;;  %v47_v7 = vld [vmem:[%s1726_s0] sm:$0xff]  ;;  %v148_v12 = vld [vmem:[%s1729_s3 + $0x18] sm:$0xff]  ;;  %s1470_s16 = smov 32   ;;  %vm266_vm4 = vcmask 254976  }
  0x17   :  { %v48_v8 = vld [vmem:[%s1726_s0 + $0x8] sm:$0xff]  ;;  %v1554_v9 = vpack.c.bf16 %v146_v6, %v145_v4  ;;  %v49_v10 = vmax.f32 %v47_v7, 0.0  ;;  %v1121_v14 = vld [vmem:[%s1731_s5] ss:$0 sm:$0xff]  ;;  %v1566_v15 = vpack.c.bf16 %v148_v12, %v147_v11  ;;  %s1469_s0 = smov 64  }
  0x18   :  { %1289 = vmatprep.subr.bf16.mxu0 %v1288_v5  ;;  %v50_v13 = vmax.f32 %v48_v8, 0.0  ;;  %236 = vrot.lane.b32.xlu0 %v1121_v14, %s1469_s0  ;;  %v150_v16 = vld [vmem:[%s1727_s1] sm:$0x3] }
  0x19   :  { %1294 = vmatpush3.bf16.msra.mxu1 %v1554_v9  ;;  %1291 = vmatpush3.bf16.msra.mxu0 %v1288_v5  ;;  %v1117_v17 = vld [vmem:[%s1730_s4] ss:$0 sm:$0xff]  ;;  %s1471_s4 = smov 96  }
  0x1a   :  { %1186 = vmatprep.mubr.msk.f32.mxu0 %vm60_vm1, %v49_v10  ;;  %1295 = vmatprep.subr.bf16.mxu1 %v1466_v0 }
  0x1b   :  { %1298 = vmatprep.subr.bf16.mxu0 %v1466_v0 }
  0x1c   :  { %1187 = vmatmul.mubr.msk.f32.vlgmr.msra.gmra.mrb[0].mxu0 %vm60_vm1, %v50_v13 }
  0x1d   :  { %1297 = vmatpush3.bf16.msra.mxu1 %v1566_v15  ;;  %1300 = vmatpush3.bf16.msra.mxu0 %v1554_v9 }
  0x1e   :  { %1301 = vmatprep.subr.bf16.mxu0 %v1466_v0  ;;  %1208 = vmatprep.mubr.msk.f32.mxu0 %vm1467_vm0, %v1468_v1 }
  0x1f   :  { %1304 = vmatprep.subr.bf16.mxu1 %v1466_v0 }
  0x20   :  { %1198 = vmatmul.mubr.msk.f32.vlgmr.msra.gmra.mrb[0].mxu1 %vm152_vm2, %v150_v16 }
  0x21   :  { %1303 = vmatpush3.bf16.msra.mxu0 %v1566_v15  ;;  %1306 = vmatpush3.bf16.msra.mxu1 %v1554_v9 }
  0x22   :  { %1307 = vmatprep.subr.bf16.mxu1 %v1466_v0  ;;  %1219 = vmatprep.mubr.msk.f32.mxu1 %vm1467_vm0, %v1468_v1 }
  0x23   :  { %1310 = vmatprep.subr.bf16.mxu0 %v1466_v0 }
  0x25   :  { %1309 = vmatpush3.bf16.msra.mxu1 %v1566_v15 }
  0x26   :  { %1316 = vmatprep.subr.bf16.mxu1 %v1466_v0 }
  0x8a   :  { %v1594_v22 = vpop.permute.xlu0 %236 }
  0xef   :  { %v1188_v18 = vpop.f32.mrb[0].mxu0 }
  0xf0   :  { %v139_v19 = vadd.f32 %v1188_v18, %v1117_v17  ;;  %v133_v20 = vpop.f32.mrb[1].mxu0 }
  0xf1   :  { %v134_v21 = vadd.f32 %v1117_v17, %v133_v20 }
  0xf2   :  { %144 = vst.msk [vmem:[#allocation2 + $0x8] sm:$0xff] %vm142_vm3, %v139_v19 }
  0xf3   :  { %143 = vst.msk [vmem:[#allocation2] sm:$0xff] %vm142_vm3, %v134_v21  ;;  %v222_v23 = vpop.f32.mrb[0].mxu1 }
  0xf4   :  { %v239_v24 = vadd.f32 %v1594_v22, %v222_v23  ;;  %v1199_v25 = vpop.f32.mrb[1].mxu1 }
  0xf6   :  { %241 = vrot.lane.b32.xlu0 %v239_v24, %s1469_s0 }
  0xfa   :  { %257 = vrot.lane.b32.xlu0 %v150_v16, %s1470_s16  ;;  %v151_v26 = vld [vmem:[#allocation2] sm:$0x3]  ;;  %v268_v47 = vld [vmem:[#allocation2 + $0x2] sm:$0x3]  ;;  %v371_v5 = vld [vmem:[#allocation2 + $0x4] sm:$0x3] }
  0xfb   :  { %v226_v27 = vadd.f32 %v222_v23, %v151_v26 }
  0xfd   :  { %v227_v28 = vmul.f32 0.5, %v226_v27 }
  0xff   :  { %1359 = vtanh.f32 %v227_v28  ;;  %v474_v28 = vld [vmem:[#allocation2 + $0x6] sm:$0x3] }
 0x109   :  { %v1360_v29 = vpop.eup %1359 }
 0x10a   :  { %v229_v30 = vadd.f32 1.0, %v1360_v29 }
 0x10c   :  { %v230_v31 = vmul.f32 0.5, %v229_v30 }
 0x10e   :  { %v251_v38 = vsub.f32 1.0, %v230_v31 }
 0x168   :  { %v242_v32 = vpop.permute.xlu0 %241 }
 0x169   :  { %v244_v33 = vmul.f32 %v242_v32, %v230_v31 }
 0x16b   :  { %246 = vrot.lane.b32.xlu1 %v244_v33, %s1469_s0 }
 0x16c   :  { %v258_v37 = vpop.permute.xlu0 %257 }
 0x16d   :  { %v260_v40 = vmul.f32 %v258_v37, %v230_v31 }
 0x1dd   :  { %v247_v34 = vpop.permute.xlu1 %246 }
 0x1de   :  { %v249_v35 = vadd.f32 %v247_v34, %v151_v26 }
 0x1e0   :  { %1361 = vtanh.f32 %v249_v35 }
 0x1ea   :  { %v1362_v36 = vpop.eup %1361 }
 0x1eb   :  { %253 = vrot.lane.b32.xlu1 %v1362_v36, %s1471_s4 }
 0x25d   :  { %v254_v39 = vpop.permute.xlu1 %253 }
 0x25e   :  { %v256_v41 = vmul.f32 %v254_v39, %v251_v38 }
 0x260   :  { %v261_v42 = vadd.f32 %v260_v40, %v256_v41 }
 0x262   :  { %263 = vrot.lane.b32.xlu1 %v261_v42, %s1471_s4 }
 0x2d4   :  { %v264_v43 = vpop.permute.xlu1 %263 }
 0x2d5   :  { %267 = vst.msk [vmem:[#allocation3] sm:$0x3] %vm266_vm4, %v264_v43  ;;  %1209 = vmatmul.mubr.msk.f32.vlgmr.msra.gmra.mrb[2].mxu0 %vm152_vm2, %v264_v43 }
 0x2d6   :  { %1312 = vmatpush3.bf16.msra.mxu0 %v1554_v9  ;;  %1230 = vmatprep.mubr.msk.f32.mxu0 %vm1467_vm0, %v1468_v1 }
 0x2d7   :  { %1313 = vmatprep.subr.bf16.mxu0 %v1466_v0 }
 0x2da   :  { %1315 = vmatpush3.bf16.msra.mxu0 %v1566_v15 }
 0x2db   :  { %1322 = vmatprep.subr.bf16.mxu0 %v1466_v0 }
 0x3a8   :  { %v337_v44 = vpop.f32.mrb[2].mxu0 }
 0x3a9   :  { %v346_v45 = vadd.f32 %v337_v44, %v1594_v22  ;;  %v1210_v46 = vpop.f32.mrb[3].mxu0  ;;  %v341_v48 = vadd.f32 %v337_v44, %v268_v47 }
 0x3ab   :  { %348 = vrot.lane.b32.xlu0 %v346_v45, %s1469_s0  ;;  %v342_v49 = vmul.f32 0.5, %v341_v48  ;;  %v577_v48 = vld [vmem:[#allocation2 + $0x8] sm:$0x3] }
 0x3ad   :  { %1363 = vtanh.f32 %v342_v49 }
 0x3b7   :  { %v1364_v50 = vpop.eup %1363 }
 0x3b8   :  { %v344_v51 = vadd.f32 1.0, %v1364_v50 }
 0x3ba   :  { %v345_v52 = vmul.f32 0.5, %v344_v51 }
 0x3bc   :  { %v358_v58 = vsub.f32 1.0, %v345_v52  ;;  %v364_v60 = vmul.f32 %v345_v52, %v261_v42 }
 0x41d   :  { %v349_v53 = vpop.permute.xlu0 %348 }
 0x41e   :  { %v351_v54 = vmul.f32 %v349_v53, %v345_v52 }
 0x420   :  { %353 = vrot.lane.b32.xlu1 %v351_v54, %s1469_s0 }
 0x492   :  { %v354_v55 = vpop.permute.xlu1 %353 }
 0x493   :  { %v356_v56 = vadd.f32 %v354_v55, %v268_v47 }
 0x495   :  { %1365 = vtanh.f32 %v356_v56 }
 0x49f   :  { %v1366_v57 = vpop.eup %1365 }
 0x4a0   :  { %360 = vrot.lane.b32.xlu0 %v1366_v57, %s1471_s4 }
 0x512   :  { %v361_v59 = vpop.permute.xlu0 %360 }
 0x513   :  { %v363_v61 = vmul.f32 %v361_v59, %v358_v58 }
 0x515   :  { %v365_v62 = vadd.f32 %v364_v60, %v363_v61 }
 0x517   :  { %367 = vrot.lane.b32.xlu1 %v365_v62, %s1471_s4 }
 0x589   :  { %v368_v63 = vpop.permute.xlu1 %367 }
 0x58a   :  { %370 = vst.msk [vmem:[#allocation3 + $0x2] sm:$0x3] %vm266_vm4, %v368_v63  ;;  %1220 = vmatmul.mubr.msk.f32.vlgmr.msra.gmra.mrb[2].mxu1 %vm152_vm2, %v368_v63 }
 0x58b   :  { %1318 = vmatpush3.bf16.msra.mxu1 %v1554_v9  ;;  %1241 = vmatprep.mubr.msk.f32.mxu1 %vm1467_vm0, %v1468_v1 }
 0x58c   :  { %1319 = vmatprep.subr.bf16.mxu1 %v1466_v0 }
 0x58f   :  { %1321 = vmatpush3.bf16.msra.mxu1 %v1566_v15 }
 0x590   :  { %1328 = vmatprep.subr.bf16.mxu1 %v1466_v0 }
 0x65d   :  { %v440_v2 = vpop.f32.mrb[2].mxu1 }
 0x65e   :  { %v449_v3 = vadd.f32 %v440_v2, %v1594_v22  ;;  %v1221_v4 = vpop.f32.mrb[3].mxu1  ;;  %v444_v6 = vadd.f32 %v440_v2, %v371_v5 }
 0x660   :  { %451 = vrot.lane.b32.xlu0 %v449_v3, %s1469_s0  ;;  %v445_v7 = vmul.f32 0.5, %v444_v6  ;;  %v680_v6 = vld [vmem:[#allocation2 + $0xa] sm:$0x3] }
 0x662   :  { %1367 = vtanh.f32 %v445_v7 }
 0x66c   :  { %v1368_v8 = vpop.eup %1367 }
 0x66d   :  { %v447_v10 = vadd.f32 1.0, %v1368_v8 }
 0x66f   :  { %v448_v11 = vmul.f32 0.5, %v447_v10 }
 0x671   :  { %v461_v18 = vsub.f32 1.0, %v448_v11  ;;  %v467_v20 = vmul.f32 %v448_v11, %v365_v62 }
 0x6d2   :  { %v452_v12 = vpop.permute.xlu0 %451 }
 0x6d3   :  { %v454_v13 = vmul.f32 %v452_v12, %v448_v11 }
 0x6d5   :  { %456 = vrot.lane.b32.xlu1 %v454_v13, %s1469_s0 }
 0x747   :  { %v457_v14 = vpop.permute.xlu1 %456 }
 0x748   :  { %v459_v16 = vadd.f32 %v457_v14, %v371_v5 }
 0x74a   :  { %1369 = vtanh.f32 %v459_v16 }
 0x754   :  { %v1370_v17 = vpop.eup %1369 }
 0x755   :  { %463 = vrot.lane.b32.xlu0 %v1370_v17, %s1471_s4 }
 0x7c7   :  { %v464_v19 = vpop.permute.xlu0 %463 }
 0x7c8   :  { %v466_v21 = vmul.f32 %v464_v19, %v461_v18 }
 0x7ca   :  { %v468_v23 = vadd.f32 %v467_v20, %v466_v21 }
 0x7cc   :  { %470 = vrot.lane.b32.xlu1 %v468_v23, %s1471_s4 }
 0x83e   :  { %v471_v24 = vpop.permute.xlu1 %470 }
 0x83f   :  { %473 = vst.msk [vmem:[#allocation3 + $0x4] sm:$0x3] %vm266_vm4, %v471_v24  ;;  %1231 = vmatmul.mubr.msk.f32.vlgmr.msra.gmra.mrb[4].mxu0 %vm152_vm2, %v471_v24 }
 0x840   :  { %1324 = vmatpush3.bf16.msra.mxu0 %v1554_v9  ;;  %1252 = vmatprep.mubr.msk.f32.mxu0 %vm1467_vm0, %v1468_v1 }
 0x841   :  { %1325 = vmatprep.subr.bf16.mxu0 %v1466_v0 }
 0x844   :  { %1327 = vmatpush3.bf16.msra.mxu0 %v1566_v15 }
 0x845   :  { %1334 = vmatprep.subr.bf16.mxu0 %v1466_v0 }
 0x912   :  { %v543_v25 = vpop.f32.mrb[4].mxu0 }
 0x913   :  { %v552_v26 = vadd.f32 %v543_v25, %v1594_v22  ;;  %v1232_v27 = vpop.f32.mrb[5].mxu0  ;;  %v547_v29 = vadd.f32 %v543_v25, %v474_v28 }
 0x915   :  { %554 = vrot.lane.b32.xlu0 %v552_v26, %s1469_s0  ;;  %v548_v30 = vmul.f32 0.5, %v547_v29  ;;  %v783_v26 = vld [vmem:[#allocation2 + $0xc] sm:$0x3] }
 0x917   :  { %1371 = vtanh.f32 %v548_v30 }
 0x921   :  { %v1372_v31 = vpop.eup %1371 }
 0x922   :  { %v550_v32 = vadd.f32 1.0, %v1372_v31 }
 0x924   :  { %v551_v33 = vmul.f32 0.5, %v550_v32 }
 0x926   :  { %v564_v39 = vsub.f32 1.0, %v551_v33  ;;  %v570_v41 = vmul.f32 %v551_v33, %v468_v23 }
 0x987   :  { %v555_v34 = vpop.permute.xlu0 %554 }
 0x988   :  { %v557_v35 = vmul.f32 %v555_v34, %v551_v33 }
 0x98a   :  { %559 = vrot.lane.b32.xlu1 %v557_v35, %s1469_s0 }
 0x9fc   :  { %v560_v36 = vpop.permute.xlu1 %559 }
 0x9fd   :  { %v562_v37 = vadd.f32 %v560_v36, %v474_v28 }
 0x9ff   :  { %1373 = vtanh.f32 %v562_v37 }
 0xa09   :  { %v1374_v38 = vpop.eup %1373 }
 0xa0a   :  { %566 = vrot.lane.b32.xlu0 %v1374_v38, %s1471_s4 }
 0xa7c   :  { %v567_v40 = vpop.permute.xlu0 %566 }
 0xa7d   :  { %v569_v42 = vmul.f32 %v567_v40, %v564_v39 }
 0xa7f   :  { %v571_v43 = vadd.f32 %v570_v41, %v569_v42 }
 0xa81   :  { %573 = vrot.lane.b32.xlu1 %v571_v43, %s1471_s4 }
 0xaf3   :  { %v574_v44 = vpop.permute.xlu1 %573 }
 0xaf4   :  { %576 = vst.msk [vmem:[#allocation3 + $0x6] sm:$0x3] %vm266_vm4, %v574_v44  ;;  %1242 = vmatmul.mubr.msk.f32.vlgmr.msra.gmra.mrb[4].mxu1 %vm152_vm2, %v574_v44 }
 0xaf5   :  { %1330 = vmatpush3.bf16.msra.mxu1 %v1554_v9  ;;  %1263 = vmatprep.mubr.msk.f32.mxu1 %vm1467_vm0, %v1468_v1 }
 0xaf6   :  { %1331 = vmatprep.subr.bf16.mxu1 %v1466_v0 }
 0xaf9   :  { %1333 = vmatpush3.bf16.msra.mxu1 %v1566_v15 }
 0xafb   :  { %v990_v21 = vld [vmem:[#allocation3] sm:$0xff] }
 0xbc7   :  { %v646_v45 = vpop.f32.mrb[4].mxu1 }
 0xbc8   :  { %v655_v46 = vadd.f32 %v646_v45, %v1594_v22  ;;  %v1243_v47 = vpop.f32.mrb[5].mxu1  ;;  %v650_v49 = vadd.f32 %v646_v45, %v577_v48 }
 0xbca   :  { %657 = vrot.lane.b32.xlu0 %v655_v46, %s1469_s0  ;;  %v651_v50 = vmul.f32 0.5, %v650_v49  ;;  %v886_v46 = vld [vmem:[#allocation2 + $0xe] sm:$0x3] }
 0xbcc   :  { %1375 = vtanh.f32 %v651_v50 }
 0xbd6   :  { %v1376_v51 = vpop.eup %1375 }
 0xbd7   :  { %v653_v52 = vadd.f32 1.0, %v1376_v51 }
 0xbd9   :  { %v654_v53 = vmul.f32 0.5, %v653_v52 }
 0xbdb   :  { %v667_v59 = vsub.f32 1.0, %v654_v53  ;;  %v673_v61 = vmul.f32 %v654_v53, %v571_v43 }
 0xc3c   :  { %v658_v54 = vpop.permute.xlu0 %657 }
 0xc3d   :  { %v660_v55 = vmul.f32 %v658_v54, %v654_v53 }
 0xc3f   :  { %662 = vrot.lane.b32.xlu1 %v660_v55, %s1469_s0 }
 0xcb1   :  { %v663_v56 = vpop.permute.xlu1 %662 }
 0xcb2   :  { %v665_v57 = vadd.f32 %v663_v56, %v577_v48 }
 0xcb4   :  { %1377 = vtanh.f32 %v665_v57  ;;  %v993_v57 = vld [vmem:[%s1732_s6 + $0x8] sm:$0xff] }
 0xcbe   :  { %v1378_v58 = vpop.eup %1377 }
 0xcbf   :  { %669 = vrot.lane.b32.xlu0 %v1378_v58, %s1471_s4 }
 0xd31   :  { %v670_v60 = vpop.permute.xlu0 %669 }
 0xd32   :  { %v672_v62 = vmul.f32 %v670_v60, %v667_v59  ;;  %v994_v59 = vld [vmem:[%s1732_s6 + $0x10] sm:$0xff]  ;;  %v995_v60 = vld [vmem:[%s1732_s6 + $0x18] sm:$0xff] }
 0xd34   :  { %v674_v63 = vadd.f32 %v673_v61, %v672_v62  ;;  %v1344_v61 = vpack.c.bf16 %v995_v60, %v994_v59 }
 0xd36   :  { %676 = vrot.lane.b32.xlu1 %v674_v63, %s1471_s4 }
 0xda8   :  { %v677_v2 = vpop.permute.xlu1 %676 }
 0xda9   :  { %679 = vst.msk [vmem:[#allocation3 + $0x8] sm:$0x3] %vm266_vm4, %v677_v2  ;;  %1253 = vmatmul.mubr.msk.f32.vlgmr.msra.gmra.mrb[6].mxu0 %vm152_vm2, %v677_v2 }
 0xdaa   :  { %1336 = vmatpush3.bf16.msra.mxu0 %v1554_v9  ;;  %1274 = vmatprep.mubr.msk.f32.mxu0 %vm1467_vm0, %v1468_v1 }
 0xdab   :  { %1337 = vmatprep.subr.bf16.mxu0 %v1466_v0 }
 0xdae   :  { %1339 = vmatpush3.bf16.msra.mxu0 %v1566_v15 }
 0xe7c   :  { %v749_v3 = vpop.f32.mrb[6].mxu0 }
 0xe7d   :  { %v758_v4 = vadd.f32 %v749_v3, %v1594_v22  ;;  %v1254_v5 = vpop.f32.mrb[7].mxu0  ;;  %v753_v7 = vadd.f32 %v749_v3, %v680_v6 }
 0xe7f   :  { %760 = vrot.lane.b32.xlu0 %v758_v4, %s1469_s0  ;;  %v754_v8 = vmul.f32 0.5, %v753_v7 }
 0xe81   :  { %1379 = vtanh.f32 %v754_v8 }
 0xe8b   :  { %v1380_v10 = vpop.eup %1379 }
 0xe8c   :  { %v756_v11 = vadd.f32 1.0, %v1380_v10 }
 0xe8e   :  { %v757_v9 = vmul.f32 0.5, %v756_v11 }
 0xe90   :  { %v770_v14 = vsub.f32 1.0, %v757_v9  ;;  %v776_v17 = vmul.f32 %v757_v9, %v674_v63 }
 0xef1   :  { %v761_v12 = vpop.permute.xlu0 %760 }
 0xef2   :  { %v763_v13 = vmul.f32 %v761_v12, %v757_v9 }
 0xef4   :  { %765 = vrot.lane.b32.xlu1 %v763_v13, %s1469_s0 }
 0xf66   :  { %v766_v0 = vpop.permute.xlu1 %765 }
 0xf67   :  { %v768_v1 = vadd.f32 %v766_v0, %v680_v6 }
 0xf69   :  { %1381 = vtanh.f32 %v768_v1 }
 0xf73   :  { %v1382_v15 = vpop.eup %1381 }
 0xf74   :  { %772 = vrot.lane.b32.xlu0 %v1382_v15, %s1471_s4 }
 0xfe6   :  { %v773_v16 = vpop.permute.xlu0 %772 }
 0xfe7   :  { %v775_v18 = vmul.f32 %v773_v16, %v770_v14 }
 0xfe9   :  { %v777_v19 = vadd.f32 %v776_v17, %v775_v18 }
 0xfeb   :  { %779 = vrot.lane.b32.xlu1 %v777_v19, %s1471_s4 }
0x105d   :  { %v780_v20 = vpop.permute.xlu1 %779 }
0x105e   :  { %782 = vst.msk [vmem:[#allocation3 + $0xa] sm:$0x3] %vm266_vm4, %v780_v20  ;;  %1264 = vmatmul.mubr.msk.f32.vlgmr.msra.gmra.mrb[6].mxu1 %vm152_vm2, %v780_v20 }
0x105f   :  { %1285 = vmatprep.mubr.msk.f32.mxu1 %vm152_vm2, %v990_v21 }
0x1131   :  { %v852_v23 = vpop.f32.mrb[6].mxu1 }
0x1132   :  { %v861_v24 = vadd.f32 %v852_v23, %v1594_v22  ;;  %v1265_v25 = vpop.f32.mrb[7].mxu1  ;;  %v856_v27 = vadd.f32 %v852_v23, %v783_v26 }
0x1134   :  { %863 = vrot.lane.b32.xlu0 %v861_v24, %s1469_s0  ;;  %v857_v28 = vmul.f32 0.5, %v856_v27 }
0x1136   :  { %1383 = vtanh.f32 %v857_v28 }
0x1140   :  { %v1384_v29 = vpop.eup %1383 }
0x1141   :  { %v859_v30 = vadd.f32 1.0, %v1384_v29 }
0x1143   :  { %v860_v31 = vmul.f32 0.5, %v859_v30 }
0x1145   :  { %v873_v37 = vsub.f32 1.0, %v860_v31  ;;  %v879_v39 = vmul.f32 %v860_v31, %v777_v19 }
0x11a6   :  { %v864_v32 = vpop.permute.xlu0 %863 }
0x11a7   :  { %v866_v33 = vmul.f32 %v864_v32, %v860_v31 }
0x11a9   :  { %868 = vrot.lane.b32.xlu1 %v866_v33, %s1469_s0 }
0x121b   :  { %v869_v34 = vpop.permute.xlu1 %868 }
0x121c   :  { %v871_v35 = vadd.f32 %v869_v34, %v783_v26 }
0x121e   :  { %1385 = vtanh.f32 %v871_v35 }
0x1228   :  { %v1386_v36 = vpop.eup %1385 }
0x1229   :  { %875 = vrot.lane.b32.xlu0 %v1386_v36, %s1471_s4 }
0x129b   :  { %v876_v38 = vpop.permute.xlu0 %875 }
0x129c   :  { %v878_v40 = vmul.f32 %v876_v38, %v873_v37 }
0x129e   :  { %v880_v41 = vadd.f32 %v879_v39, %v878_v40 }
0x12a0   :  { %882 = vrot.lane.b32.xlu1 %v880_v41, %s1471_s4 }
0x1312   :  { %v883_v42 = vpop.permute.xlu1 %882 }
0x1313   :  { %885 = vst.msk [vmem:[#allocation3 + $0xc] sm:$0x3] %vm266_vm4, %v883_v42  ;;  %1275 = vmatmul.mubr.msk.f32.vlgmr.msra.gmra.mrb[8].mxu0 %vm152_vm2, %v883_v42 }
0x13e6   :  { %v955_v43 = vpop.f32.mrb[8].mxu0 }
0x13e7   :  { %v964_v44 = vadd.f32 %v955_v43, %v1594_v22  ;;  %v1276_v45 = vpop.f32.mrb[9].mxu0  ;;  %v959_v47 = vadd.f32 %v955_v43, %v886_v46  ;;  %v992_v22 = vld [vmem:[%s1732_s6] sm:$0xff]  ;;  %s1472_s6 = smov [#allocation8]  }
0x13e8   :  { %v1340_v58 = vpack.c.bf16 %v993_v57, %v992_v22  ;;  %s1104_s2 = sshll.u32 %s1472_s6, 4  ;;  %s1105_s2 = int_to_ptr.vmem [resolvable:$true] %s1104_s2 }
0x13e9   :  { %966 = vrot.lane.b32.xlu0 %v964_v44, %s1469_s0  ;;  %v960_v48 = vmul.f32 0.5, %v959_v47  ;;  %s1413_s27 = scalar_lea.vmem %s1105_s2, 32  ;;  %p1418_p9 = scmp.lt.s32.totalorder %s1105_s2, %s1105_s2 }
0x13ea   :  { %1341 = vmatprep.subr.bf16.mxu1 %v1340_v58  ;;  %p1414_p8 = scmp.ne.s32.totalorder %s1105_s2, %s1413_s27  ;;  %p1419_p10 = scmp.lt.s32.totalorder %s1413_s27, %s1413_s27 }
0x13eb   :  { %1387 = vtanh.f32 %v960_v48  ;;  %1343 = vmatpush3.bf16.msra.mxu1 %v1340_v58 }
0x13ec   :  { %1345 = vmatprep.subr.bf16.mxu1 %v1344_v61  ;;  %p1420_p11 = por %p1419_p10, %p1418_p9 }
0x13ee   :  { %p1421_p12 = pnand %p1420_p11, %p1414_p8 }
0x13ef   :  { %1347 = vmatpush3.bf16.msra.mxu1 %v1344_v61 }
0x13f5   :  { %v1388_v49 = vpop.eup %1387 }
0x13f6   :  { %v962_v50 = vadd.f32 1.0, %v1388_v49 }
0x13f8   :  { %v963_v51 = vmul.f32 0.5, %v962_v50 }
0x13fa   :  { %v976_v62 = vsub.f32 1.0, %v963_v51  ;;  %v982_v2 = vmul.f32 %v963_v51, %v880_v41 }
0x145b   :  { %v967_v52 = vpop.permute.xlu0 %966 }
0x145c   :  { %v969_v53 = vmul.f32 %v967_v52, %v963_v51 }
0x145e   :  { %971 = vrot.lane.b32.xlu1 %v969_v53, %s1469_s0 }
0x14d0   :  { %v972_v54 = vpop.permute.xlu1 %971 }
0x14d1   :  { %v974_v55 = vadd.f32 %v972_v54, %v886_v46 }
0x14d3   :  { %1389 = vtanh.f32 %v974_v55 }
0x14dd   :  { %v1390_v56 = vpop.eup %1389 }
0x14de   :  { %978 = vrot.lane.b32.xlu0 %v1390_v56, %s1471_s4 }
0x1550   :  { %v979_v63 = vpop.permute.xlu0 %978 }
0x1551   :  { %v981_v3 = vmul.f32 %v979_v63, %v976_v62 }
0x1553   :  { %v983_v4 = vadd.f32 %v982_v2, %v981_v3 }
0x1555   :  { %985 = vrot.lane.b32.xlu1 %v983_v4, %s1471_s4 }
0x15c7   :  { %v986_v5 = vpop.permute.xlu1 %985 }
0x15c8   :  { %988 = vst.msk [vmem:[#allocation3 + $0xe] sm:$0x3] %vm266_vm4, %v986_v5  ;;  %989 = vst.msk [vmem:[#allocation8] sm:$0x3] %vm266_vm4, %v986_v5 }
0x15cf   :  { %v991_v6 = vld [vmem:[#allocation3 + $0x8] sm:$0xff] }
0x15d0   :  { %1286 = vmatmul.mubr.msk.f32.vlgmr.msra.gmra.mrb[8].mxu1 %vm152_vm2, %v991_v6 }
0x15d1   :  { %1424 = shalt.err (!%p1421_p12)
}
0x15d2   :  { %s1425_s30 = scalar_lea.hbm %s1735_s9, 32 }
0x15d3   :  { %p1426_p13 = scmp.ne.s32.totalorder %s1735_s9, %s1425_s30  ;;  %p1429_p0 = scmp.lt.u32.totalorder %s1425_s30, %s1735_s9 }
0x15d5   :  { %p1431_p1 = pnand %p1429_p0, %p1426_p13 }
0x15d7   :  { %1434 = shalt.err (!%p1431_p1)
}
0x15d8   :  { %1107 = dma.vmem_to_hbm [thread:$0]  %s1105_s2, 32, %s1735_s9, [#allocation9]   ;;  %v1129_v7 = vld [vmem:[%s1733_s7] ss:$0 sm:$0xff] }
0x15d9   :  { %s1473_s1 = smov [#allocation7]  }
0x15da   :  { %s1091_s15 = sshll.u32 %s1473_s1, 4  ;;  %s1092_s15 = int_to_ptr.vmem [resolvable:$true] %s1091_s15 }
0x15db   :  { %s1435_s16 = scalar_lea.vmem %s1092_s15, 256  ;;  %p1440_p3 = scmp.lt.s32.totalorder %s1092_s15, %s1092_s15 }
0x15dc   :  { %p1436_p2 = scmp.ne.s32.totalorder %s1092_s15, %s1435_s16  ;;  %p1441_p4 = scmp.lt.s32.totalorder %s1435_s16, %s1435_s16 }
0x15de   :  { %p1442_p5 = por %p1441_p4, %p1440_p3 }
0x15e0   :  { %p1443_p6 = pnand %p1442_p5, %p1436_p2 }
0x16a3   :  { %v1287_v8 = vpop.f32.mrb[8].mxu1 }
0x16a4   :  { %v1081_v10 = vadd.f32 %v1287_v8, %v1129_v7  ;;  %v1075_v11 = vpop.f32.mrb[9].mxu1 }
0x16a5   :  { %v1076_v9 = vadd.f32 %v1129_v7, %v1075_v11 }
0x16a6   :  { %1085 = vst.msk [vmem:[#allocation7 + $0x8] sm:$0xff] %vm60_vm1, %v1081_v10 }
0x16a7   :  { %1084 = vst.msk [vmem:[#allocation7] sm:$0xff] %vm60_vm1, %v1076_v9 }
0x16a8   :  { %1446 = shalt.err (!%p1443_p6)
}
0x16a9   :  { %s1447_s4 = scalar_lea.hbm %s1734_s8, 256 }
0x16aa   :  { %p1448_p7 = scmp.ne.s32.totalorder %s1734_s8, %s1447_s4  ;;  %p1451_p8 = scmp.lt.u32.totalorder %s1447_s4, %s1734_s8 }
0x16ac   :  { %p1453_p9 = pnand %p1451_p8, %p1448_p7 }
0x16ae   :  { %1456 = shalt.err (!%p1453_p9)
}
0x16af   :  { %1097 = dma.vmem_to_hbm [thread:$0]  %s1092_s15, 256, %s1734_s8, [#allocation6], %s1464_s19, %s1464_s19, %s1465_s20  }
0x16b0   :  { %1459 = dma.done.wait [#allocation6], 256  }
0x16b1   :  { %1460 = vsyncadd [#allocation6], 4294967040 }
0x16b2   :  { %1461 = dma.done.wait [#allocation9], 32  }
0x16b3   :  { %1462 = vsyncadd [#allocation9], 4294967264 }
0x16b4   :  { %1114 = vsyncpa [#allocation5], 1 }
0x16b5   :  { %1115 = vsyncpa [#allocation6], 1 }
0x16b6   :  { %1116 = vsyncpa [#allocation9], 1 }

</bundles_post_ra>
